<compile_context>
chip_gen: v5e
topology: v5e:2x2
jax: 0.10.0
libtpu: 0.0.40
codegen_flags: <defaults>
</compile_context>

<pallas_src>
import functools
import math

import jax
import jax.numpy as jnp
from jax.experimental import pallas as pl
from jax.experimental.pallas import tpu as pltpu


# ----------------------------------------------------------------------------
# Fused kernel (single-split path): tiled avg+max pooling -> shared MLP -> sigmoid
# ----------------------------------------------------------------------------
def _pool_mlp_kernel(x_ref, w1_ref, w2_ref, o_ref, sum_acc, max_acc,
                     *, inv_hw, hw, hw_tile, needs_mask):
    si = pl.program_id(1)

    xt = x_ref[...].astype(jnp.float32)                     # (C, hw_tile)
    if needs_mask:
        valid = hw - si * hw_tile                            # >= 1 for every real block
        lane = jax.lax.broadcasted_iota(jnp.int32, xt.shape, 1)
        m = lane < valid
        tile_sum = jnp.sum(jnp.where(m, xt, 0.0), axis=1, keepdims=True)
        tile_max = jnp.max(jnp.where(m, xt, -jnp.inf), axis=1, keepdims=True)
    else:
        tile_sum = jnp.sum(xt, axis=1, keepdims=True)        # (C, 1)
        tile_max = jnp.max(xt, axis=1, keepdims=True)        # (C, 1)

    @pl.when(si == 0)
    def _init():
        sum_acc[...] = tile_sum
        max_acc[...] = tile_max

    @pl.when(si > 0)
    def _accumulate():
        sum_acc[...] = sum_acc[...] + tile_sum
        max_acc[...] = jnp.maximum(max_acc[...], tile_max)

    @pl.when(si == pl.num_programs(1) - 1)
    def _finalize():
        c = sum_acc.shape[0]
        # pooled[:, 0] = avg, pooled[:, 1] = max  (built without concat)
        lane2 = jax.lax.broadcasted_iota(jnp.int32, (c, 2), 1)
        pooled = jnp.where(lane2 == 0, sum_acc[...] * inv_hw, max_acc[...])   # (C, 2)
        # One MXU dot for both pooled vectors, relu, sum columns (second 1x1 conv
        # is linear & bias-free so MLP(avg)+MLP(max) == W2 @ (relu(W1@avg)+relu(W1@mx))).
        h = jnp.maximum(jnp.dot(w1_ref[...], pooled,
                                preferred_element_type=jnp.float32), 0.0)     # (C/r, 2)
        h_sum = jnp.sum(h, axis=1, keepdims=True)                             # (C/r, 1)
        y = jnp.dot(w2_ref[...], h_sum, preferred_element_type=jnp.float32)   # (C, 1)
        o_ref[...] = jax.nn.sigmoid(y).astype(o_ref.dtype)


# ----------------------------------------------------------------------------
# Partial-pooling kernel (spatial_splits > 1, e.g. v7x megacore with N == 1):
# each split produces f32 (sum, max) partials; tiny JAX epilogue combines + MLP.
# ----------------------------------------------------------------------------
def _pool_partial_kernel(x_ref, part_ref, sum_acc, max_acc,
                         *, hw, hw_tile, blocks_per_split, needs_mask):
    p = pl.program_id(0)
    si = pl.program_id(2)

    xt = x_ref[...].astype(jnp.float32)                      # (C, hw_tile)
    if needs_mask:
        gb = p * blocks_per_split + si                        # global block index (unclamped)
        valid = hw - gb * hw_tile                             # <= 0 for padded duplicate blocks
        lane = jax.lax.broadcasted_iota(jnp.int32, xt.shape, 1)
        m = lane < valid
        tile_sum = jnp.sum(jnp.where(m, xt, 0.0), axis=1, keepdims=True)
        tile_max = jnp.max(jnp.where(m, xt, -jnp.inf), axis=1, keepdims=True)
    else:
        tile_sum = jnp.sum(xt, axis=1, keepdims=True)
        tile_max = jnp.max(xt, axis=1, keepdims=True)

    @pl.when(si == 0)
    def _init():
        sum_acc[...] = tile_sum
        max_acc[...] = tile_max

    @pl.when(si > 0)
    def _accumulate():
        sum_acc[...] = sum_acc[...] + tile_sum
        max_acc[...] = jnp.maximum(max_acc[...], tile_max)

    @pl.when(si == blocks_per_split - 1)
    def _finalize():
        c = sum_acc.shape[0]
        lane2 = jax.lax.broadcasted_iota(jnp.int32, (c, 2), 1)
        part_ref[...] = jnp.where(lane2 == 0, sum_acc[...], max_acc[...])     # (C, 2)


# ----------------------------------------------------------------------------
# Tiling helpers (generation-aware)
# ----------------------------------------------------------------------------
def _vmem_capacity_bytes():
    try:
        return int(pltpu.get_tpu_info().vmem_capacity_bytes)
    except Exception:
        return 128 << 20    # v5e/v6e default; conservative fallback


def _choose_spatial_tile(hw, c, itemsize, vmem_cap):
    """~4-8 MiB blocks (bounded by VMEM capacity), multiple of 128 lanes."""
    target = max(1 << 20, min(8 << 20, vmem_cap // 12))
    lanes = target // max(1, c * itemsize)
    lanes = max(128, (lanes // 128) * 128)
    if hw <= lanes:
        return hw                        # single full-extent block
    return int(lanes)


# ----------------------------------------------------------------------------
# Public wrapper
# ----------------------------------------------------------------------------
def channel_attention(x, w1, w2, *, spatial_tile=None, spatial_splits=1):
    """CBAM ChannelAttentionModule forward.

    x : (N, C, H, W) activations (f32 or bf16)
    w1: (C//r, C, 1, 1) first 1x1 conv weight (bias-free)
    w2: (C, C//r, 1, 1) second 1x1 conv weight (bias-free)
    spatial_splits > 1 splits the spatial reduction across a parallel grid axis
    (useful on v7x megacore when N == 1); otherwise everything is one fused kernel.
    returns (N, C, 1, 1) attention map in x.dtype.
    """
    n, c, h, w = x.shape
    cr = w1.shape[0]
    assert w1.shape == (cr, c, 1, 1) and w2.shape == (c, cr, 1, 1)
    hw = h * w

    x3 = x.reshape(n, c, hw)                            # free: contiguous reshape
    w1m = w1.reshape(cr, c).astype(jnp.float32)
    w2m = w2.reshape(c, cr).astype(jnp.float32)

    vmem_cap = _vmem_capacity_bytes()
    if spatial_tile is None:
        hw_tile = _choose_spatial_tile(hw, c, x3.dtype.itemsize, vmem_cap)
    else:
        hw_tile = min(int(spatial_tile), hw)
    assert hw_tile == hw or hw_tile % 128 == 0, (
        "spatial tile must be a multiple of 128 lanes or the full spatial extent")

    total_blocks = pl.cdiv(hw, hw_tile)
    needs_mask = (hw % hw_tile) != 0
    tile_bytes = c * hw_tile * x3.dtype.itemsize
    # double-buffered x blocks + weights/output/scratch headroom, clipped to capacity
    vmem_limit = int(min(vmem_cap, max(32 << 20, 2 * tile_bytes + (8 << 20))))

    splits = max(1, min(int(spatial_splits), total_blocks))

    if splits == 1:
        kernel = functools.partial(_pool_mlp_kernel, inv_hw=1.0 / hw,
                                   hw=hw, hw_tile=hw_tile, needs_mask=needs_mask)
        out = pl.pallas_call(
            kernel,
            out_shape=jax.ShapeDtypeStruct((n, c, 1), x.dtype),
            grid_spec=pltpu.PrefetchScalarGridSpec(
                num_scalar_prefetch=0,
                grid=(n, total_blocks),
                in_specs=[
                    pl.BlockSpec((pl.Squeezed(), c, hw_tile), lambda ni, si: (ni, 0, si)),
                    pl.BlockSpec((cr, c), lambda ni, si: (0, 0)),
                    pl.BlockSpec((c, cr), lambda ni, si: (0, 0)),
                ],
                out_specs=pl.BlockSpec((pl.Squeezed(), c, 1), lambda ni, si: (ni, 0, 0)),
                scratch_shapes=[pltpu.VMEM((c, 1), jnp.float32),
                                pltpu.VMEM((c, 1), jnp.float32)],
            ),
            compiler_params=pltpu.CompilerParams(
                dimension_semantics=("parallel", "arbitrary"),
                vmem_limit_bytes=vmem_limit),
        )(x3, w1m, w2m)
        return out.reshape(n, c, 1, 1)

    # ---- spatial_splits > 1: partial pooling kernel + tiny JAX epilogue ----
    bps = pl.cdiv(total_blocks, splits)
    needs_mask_p = needs_mask or (total_blocks % splits != 0)

    def x_index(p, ni, si):
        gb = jnp.minimum(p * bps + si, total_blocks - 1)    # clamp padded blocks in-bounds
        return (ni, 0, gb)

    kernel = functools.partial(_pool_partial_kernel, hw=hw, hw_tile=hw_tile,
                               blocks_per_split=bps, needs_mask=needs_mask_p)
    part = pl.pallas_call(
        kernel,
        out_shape=jax.ShapeDtypeStruct((splits, n, c, 2), jnp.float32),
        grid_spec=pltpu.PrefetchScalarGridSpec(
            num_scalar_prefetch=0,
            grid=(splits, n, bps),
            in_specs=[pl.BlockSpec((pl.Squeezed(), c, hw_tile), x_index)],
            out_specs=pl.BlockSpec((pl.Squeezed(), pl.Squeezed(), c, 2),
                                   lambda p, ni, si: (p, ni, 0, 0)),
            scratch_shapes=[pltpu.VMEM((c, 1), jnp.float32),
                            pltpu.VMEM((c, 1), jnp.float32)],
        ),
        compiler_params=pltpu.CompilerParams(
            dimension_semantics=("parallel", "parallel", "arbitrary"),
            vmem_limit_bytes=vmem_limit),
    )(x3)

    sums = jnp.sum(part[..., 0], axis=0)                    # (N, C)
    maxs = jnp.max(part[..., 1], axis=0)                    # (N, C)
    avg = sums * (1.0 / hw)
    h_avg = jnp.maximum(avg @ w1m.T, 0.0)
    h_max = jnp.maximum(maxs @ w1m.T, 0.0)
    att = jax.nn.sigmoid((h_avg + h_max) @ w2m.T).astype(x.dtype)
    return att[:, :, None, None]


# ----------------------------------------------------------------------------
# Pure-JAX reference (mirrors the PyTorch module) and param init
# ----------------------------------------------------------------------------
def channel_attention_ref(x, w1, w2):
    xf = x.astype(jnp.float32)
    avg = jnp.mean(xf, axis=(2, 3))                          # (N, C)
    mx = jnp.max(xf, axis=(2, 3))                            # (N, C)
    w1m = w1.reshape(w1.shape[0], w1.shape[1]).astype(jnp.float32)   # (C/r, C)
    w2m = w2.reshape(w2.shape[0], w2.shape[1]).astype(jnp.float32)   # (C, C/r)

    def mlp(v):
        return jnp.maximum(v @ w1m.T, 0.0) @ w2m.T

    att = jax.nn.sigmoid(mlp(avg) + mlp(mx))
    return att[:, :, None, None]


def init_params(key, channel, ratio=16):
    cr = channel // ratio
    k1, k2 = jax.random.split(key)
    b1 = 1.0 / math.sqrt(channel)
    b2 = 1.0 / math.sqrt(cr)
    w1 = jax.random.uniform(k1, (cr, channel, 1, 1), jnp.float32, -b1, b1)
    w2 = jax.random.uniform(k2, (channel, cr, 1, 1), jnp.float32, -b2, b2)
    return w1, w2


if __name__ == "__main__":
    key = jax.random.PRNGKey(0)
    kx, kp, kx2 = jax.random.split(key, 3)

    N, C, H, W, RATIO = 2, 64, 16, 16, 16
    x = jax.random.normal(kx, (N, C, H, W), jnp.float32)
    w1, w2 = init_params(kp, C, RATIO)
    ref = channel_attention_ref(x, w1, w2)

    # default: single fused kernel, auto tile
    fwd = jax.jit(channel_attention)
    out = jax.block_until_ready(fwd(x, w1, w2))
    assert out.shape == (N, C, 1, 1), out.shape
    assert bool(jnp.all(jnp.isfinite(out.astype(jnp.float32))))
    assert bool(jnp.max(jnp.abs(out.astype(jnp.float32) - ref)) < 5e-4)

    # multi-tile spatial reduction (2 tiles of 128 lanes)
    fwd_tiled = jax.jit(functools.partial(channel_attention, spatial_tile=128))
    out2 = jax.block_until_ready(fwd_tiled(x, w1, w2))
    assert bool(jnp.max(jnp.abs(out2.astype(jnp.float32) - ref)) < 5e-4)

    # non-128-multiple spatial extent -> masked last tile (hw = 135)
    x_odd = jax.random.normal(kx2, (N, C, 9, 15), jnp.float32)
    ref_odd = channel_attention_ref(x_odd, w1, w2)
    out3 = jax.block_until_ready(fwd_tiled(x_odd, w1, w2))
    assert bool(jnp.max(jnp.abs(out3.astype(jnp.float32) - ref_odd)) < 5e-4)

    # spatial-split path (v7x megacore small-batch layout): partials + epilogue
    fwd_split = jax.jit(functools.partial(channel_attention,
                                          spatial_tile=128, spatial_splits=2))
    out4 = jax.block_until_ready(fwd_split(x, w1, w2))
    assert bool(jnp.max(jnp.abs(out4.astype(jnp.float32) - ref)) < 5e-4)
    out5 = jax.block_until_ready(fwd_split(x_odd, w1, w2))
    assert bool(jnp.max(jnp.abs(out5.astype(jnp.float32) - ref_odd)) < 5e-4)

    # bf16 input: half the streamed HBM bytes, f32 accumulation, bf16 output
    xb = x.astype(jnp.bfloat16)
    outb = jax.block_until_ready(fwd(xb, w1, w2))
    assert outb.dtype == jnp.bfloat16
    assert bool(jnp.max(jnp.abs(outb.astype(jnp.float32) - ref)) < 2e-2)

    print("KERNEL_OK")
</pallas_src>

<mosaic_0001>
module attributes {stable_mosaic.version = 11 : i64} {
  func.func @_pool_mlp_kernel(%arg0: i32, %arg1: i32, %arg2: memref<1x64x256xf32, #tpu.memory_space<vmem>>, %arg3: memref<4x64xf32, #tpu.memory_space<vmem>>, %arg4: memref<64x4xf32, #tpu.memory_space<vmem>>, %arg5: memref<1x64x1xf32, #tpu.memory_space<vmem>>, %arg6: memref<64x1xf32, #tpu.memory_space<vmem>>, %arg7: memref<64x1xf32, #tpu.memory_space<vmem>>) attributes {dimension_semantics = [#tpu.dimension_semantics<parallel>, #tpu.dimension_semantics<arbitrary>], iteration_bounds = array<i64: 2, 1>, scalar_prefetch = 0 : i64, scratch_operands = 2 : i64, tpu.core_type = #tpu.core_type<tc>, window_params = [{transform_indices = @transform_0, window_bounds = array<i64: 1, 64, 256>}, {pipeline_mode = #tpu.pipeline_mode<synchronous>, transform_indices = @transform_1, window_bounds = array<i64: 4, 64>}, {pipeline_mode = #tpu.pipeline_mode<synchronous>, transform_indices = @transform_2, window_bounds = array<i64: 64, 4>}, {transform_indices = @transform_3, window_bounds = array<i64: 1, 64, 1>}]} {
    %c0 = arith.constant 0 : index
    %c0_0 = arith.constant 0 : index
    %c0_1 = arith.constant 0 : index
    %0 = vector.load %arg2[%c0, %c0_0, %c0_1] : memref<1x64x256xf32, #tpu.memory_space<vmem>>, vector<1x64x256xf32>
    %1 = vector.shape_cast %0 : vector<1x64x256xf32> to vector<64x256xf32>
    %cst = arith.constant dense<0.000000e+00> : vector<64xf32>
    %2 = vector.multi_reduction <add>, %1, %cst [1] : vector<64x256xf32> to vector<64xf32>
    %3 = vector.shape_cast %2 : vector<64xf32> to vector<64x1xf32>
    %cst_2 = arith.constant dense<0xFF800000> : vector<64xf32>
    %4 = vector.multi_reduction <maximumf>, %1, %cst_2 [1] : vector<64x256xf32> to vector<64xf32>
    %5 = vector.shape_cast %4 : vector<64xf32> to vector<64x1xf32>
    %c0_i32 = arith.constant 0 : i32
    %6 = arith.cmpi eq, %arg1, %c0_i32 : i32
    %7 = arith.extui %6 : i1 to i32
    %c0_i32_3 = arith.constant 0 : i32
    %8 = arith.cmpi ne, %7, %c0_i32_3 : i32
    scf.if %8 {
      %c0_8 = arith.constant 0 : index
      %c0_9 = arith.constant 0 : index
      %15 = vector.load %arg6[%c0_8, %c0_9] : memref<64x1xf32, #tpu.memory_space<vmem>>, vector<64x1xf32>
      tpu.vector_store %arg6[%c0_8, %c0_9], %3 {strides = array<i32>} : memref<64x1xf32, #tpu.memory_space<vmem>>, vector<64x1xf32>,
      %c0_10 = arith.constant 0 : index
      %c0_11 = arith.constant 0 : index
      %16 = vector.load %arg7[%c0_10, %c0_11] : memref<64x1xf32, #tpu.memory_space<vmem>>, vector<64x1xf32>
      tpu.vector_store %arg7[%c0_10, %c0_11], %5 {strides = array<i32>} : memref<64x1xf32, #tpu.memory_space<vmem>>, vector<64x1xf32>,
    } else {
    }
    %c0_i32_4 = arith.constant 0 : i32
    %9 = arith.cmpi sgt, %arg1, %c0_i32_4 : i32
    %10 = arith.extui %9 : i1 to i32
    %c0_i32_5 = arith.constant 0 : i32
    %11 = arith.cmpi ne, %10, %c0_i32_5 : i32
    scf.if %11 {
      %c0_8 = arith.constant 0 : index
      %c0_9 = arith.constant 0 : index
      %15 = vector.load %arg6[%c0_8, %c0_9] : memref<64x1xf32, #tpu.memory_space<vmem>>, vector<64x1xf32>
      %16 = arith.addf %15, %3 : vector<64x1xf32>
      %c0_10 = arith.constant 0 : index
      %c0_11 = arith.constant 0 : index
      %17 = vector.load %arg6[%c0_10, %c0_11] : memref<64x1xf32, #tpu.memory_space<vmem>>, vector<64x1xf32>
      tpu.vector_store %arg6[%c0_10, %c0_11], %16 {strides = array<i32>} : memref<64x1xf32, #tpu.memory_space<vmem>>, vector<64x1xf32>,
      %c0_12 = arith.constant 0 : index
      %c0_13 = arith.constant 0 : index
      %18 = vector.load %arg7[%c0_12, %c0_13] : memref<64x1xf32, #tpu.memory_space<vmem>>, vector<64x1xf32>
      %19 = arith.maximumf %18, %5 : vector<64x1xf32>
      %c0_14 = arith.constant 0 : index
      %c0_15 = arith.constant 0 : index
      %20 = vector.load %arg7[%c0_14, %c0_15] : memref<64x1xf32, #tpu.memory_space<vmem>>, vector<64x1xf32>
      tpu.vector_store %arg7[%c0_14, %c0_15], %19 {strides = array<i32>} : memref<64x1xf32, #tpu.memory_space<vmem>>, vector<64x1xf32>,
    } else {
    }
    %c0_i32_6 = arith.constant 0 : i32
    %12 = arith.cmpi eq, %arg1, %c0_i32_6 : i32
    %13 = arith.extui %12 : i1 to i32
    %c0_i32_7 = arith.constant 0 : i32
    %14 = arith.cmpi ne, %13, %c0_i32_7 : i32
    scf.if %14 {
      %15 = tpu.iota {dimensions = array<i32: 1>} : vector<64x2xi32>
      %c0_i32_8 = arith.constant 0 : i32
      %16 = vector.broadcast %c0_i32_8 : i32 to vector<64x2xi32>
      %17 = arith.cmpi eq, %15, %16 : vector<64x2xi32>
      %c0_9 = arith.constant 0 : index
      %c0_10 = arith.constant 0 : index
      %18 = vector.load %arg6[%c0_9, %c0_10] : memref<64x1xf32, #tpu.memory_space<vmem>>, vector<64x1xf32>
      %cst_11 = arith.constant 3.906250e-03 : f32
      %19 = vector.broadcast %cst_11 : f32 to vector<64x1xf32>
      %20 = arith.mulf %18, %19 : vector<64x1xf32>
      %c0_12 = arith.constant 0 : index
      %c0_13 = arith.constant 0 : index
      %21 = vector.load %arg7[%c0_12, %c0_13] : memref<64x1xf32, #tpu.memory_space<vmem>>, vector<64x1xf32>
      %22 = vector.shape_cast %20 : vector<64x1xf32> to vector<64x1xf32>
      %23 = vector.broadcast %22 : vector<64x1xf32> to vector<64x2xf32>
      %24 = vector.shape_cast %21 : vector<64x1xf32> to vector<64x1xf32>
      %25 = vector.broadcast %24 : vector<64x1xf32> to vector<64x2xf32>
      %26 = arith.select %17, %23, %25 : vector<64x2xi1>, vector<64x2xf32>
      %c0_14 = arith.constant 0 : index
      %c0_15 = arith.constant 0 : index
      %27 = vector.load %arg3[%c0_14, %c0_15] : memref<4x64xf32, #tpu.memory_space<vmem>>, vector<4x64xf32>
      %cst_16 = arith.constant dense<0.000000e+00> : vector<4x2xf32>
      %28 = tpu.matmul %27, %26, %cst_16 {dimension_numbers = #tpu.dot_dimension_numbers<[1], [0], [0], [1], [0, 0, 1, 1], [], []>} : vector<4x64xf32>, vector<64x2xf32>, vector<4x2xf32> -> vector<4x2xf32>
      %cst_17 = arith.constant 0.000000e+00 : f32
      %29 = vector.broadcast %cst_17 : f32 to vector<4x2xf32>
      %30 = arith.maximumf %28, %29 : vector<4x2xf32>
      %cst_18 = arith.constant dense<0.000000e+00> : vector<4xf32>
      %31 = vector.multi_reduction <add>, %30, %cst_18 [1] : vector<4x2xf32> to vector<4xf32>
      %32 = vector.shape_cast %31 : vector<4xf32> to vector<4x1xf32>
      %c0_19 = arith.constant 0 : index
      %c0_20 = arith.constant 0 : index
      %33 = vector.load %arg4[%c0_19, %c0_20] : memref<64x4xf32, #tpu.memory_space<vmem>>, vector<64x4xf32>
      %cst_21 = arith.constant dense<0.000000e+00> : vector<64x1xf32>
      %34 = tpu.matmul %33, %32, %cst_21 {dimension_numbers = #tpu.dot_dimension_numbers<[1], [0], [0], [1], [0, 0, 1, 1], [], []>} : vector<64x4xf32>, vector<4x1xf32>, vector<64x1xf32> -> vector<64x1xf32>
      %35 = arith.negf %34 : vector<64x1xf32>
      %36 = math.exp %35 : vector<64x1xf32>
      %cst_22 = arith.constant 1.000000e+00 : f32
      %37 = vector.broadcast %cst_22 : f32 to vector<64x1xf32>
      %38 = arith.addf %37, %36 : vector<64x1xf32>
      %39 = arith.divf %37, %38 : vector<64x1xf32>
      %c0_23 = arith.constant 0 : index
      %c0_24 = arith.constant 0 : index
      %c0_25 = arith.constant 0 : index
      %40 = vector.load %arg5[%c0_23, %c0_24, %c0_25] : memref<1x64x1xf32, #tpu.memory_space<vmem>>, vector<1x64x1xf32>
      %41 = vector.shape_cast %40 : vector<1x64x1xf32> to vector<64x1xf32>
      %42 = vector.shape_cast %39 : vector<64x1xf32> to vector<1x64x1xf32>
      tpu.vector_store %arg5[%c0_23, %c0_24, %c0_25], %42 {strides = array<i32>} : memref<1x64x1xf32, #tpu.memory_space<vmem>>, vector<1x64x1xf32>,
    } else {
    }
    return
  }
  func.func @transform_0(%arg0: i32, %arg1: i32) -> (i32, i32, i32) {
    %c0_i32 = arith.constant 0 : i32
    %c0_i32_0 = arith.constant 0 : i32
    return %arg0, %c0_i32, %arg1 : i32, i32, i32
  }
  func.func @transform_1(%arg0: i32, %arg1: i32) -> (i32, i32) {
    %c0_i32 = arith.constant 0 : i32
    %c0_i32_0 = arith.constant 0 : i32
    %c0_i32_1 = arith.constant 0 : i32
    return %c0_i32, %c0_i32_0 : i32, i32
  }
  func.func @transform_2(%arg0: i32, %arg1: i32) -> (i32, i32) {
    %c0_i32 = arith.constant 0 : i32
    %c0_i32_0 = arith.constant 0 : i32
    %c0_i32_1 = arith.constant 0 : i32
    return %c0_i32, %c0_i32_0 : i32, i32
  }
  func.func @transform_3(%arg0: i32, %arg1: i32) -> (i32, i32, i32) {
    %c0_i32 = arith.constant 0 : i32
    %c0_i32_0 = arith.constant 0 : i32
    %c0_i32_1 = arith.constant 0 : i32
    return %arg0, %c0_i32, %c0_i32_0 : i32, i32, i32
  }
}

</mosaic_0001>

<bundles_post_ra>
// kernel: channel_attention.1
= control target key start
LH: loop header
LB: loop body
LE: loop exit
PB: predicated region body
PF: predicated region fallthrough
CT: control target
= control target key end

     0   :  { %s971_s12 = smov 0   ;;  %s973_s13 = smov 0   ;;  %s1163_s0 = inlined_call_operand.vmem [shape: f32[2,64,256], index: 0, kind: input, shape index: {}]   ;;  %s1164_s1 = inlined_call_operand.vmem [shape: f32[4,64], index: 1, kind: input, shape index: {}]   ;;  %s1165_s2 = inlined_call_operand.vmem [shape: f32[64,4], index: 2, kind: input, shape index: {}]   ;;  %s1166_s3 = inlined_call_operand.vmem [shape: f32[2,64,1], index: 3, kind: output, shape index: {}]  }
   0x1   :  { %s975_s14 = smov 0  }
   0x2 LB: > { %s25_s15 = sadd.s32 1, %s944_s13  ;;  %p797_p0 = scmp.ge.s32.totalorder %s948_s14, 1  ;;  %s948_s14 = sphi %s975_s14, %s13_s14   ;;  %s944_s13 = sphi %s973_s13, %s1172_s13   ;;  %s940_s12 = sphi %s971_s12, %s1171_s12  }
   0x3   : > { %p27_p1 = scmp.ge.s32.totalorder %s25_s15, 2  ;;  %p156_p2 = scmp.lt.s32.totalorder %s948_s14, 3 }
   0x5   : > { %s1174_s15 = smov (%p27_p1, %s25_s15), 0  ;;  %p157_p3 = pnand %p797_p0, %p156_p2 }
   0x6   : > { %p185_p4 = scmp.lt.s32.totalorder (!%p157_p3), %s940_s12, 1 }
   0x7   : > { %160 = sbr.rel (%p157_p3) target bundleno = 724 (0x2d4), region = 32 }
   0xc   : > { %s1176_s12 = smov (!%p185_p4, %s940_s12), 1  ;;  %v950_v32 = vmov 0   ;;  %vm267_vm0 = vcmask 7168   ;;  %vm456_vm2 = vcmask 523264   ;;  %vm481_vm3 = vcmask 11264  }
   0xd   : > { %s822_s16 = sshll.u32 %s1176_s12, 7  ;;  %851 = vset.pattern.permute.xlu1 %v950_v32  ;;  %857 = vset.pattern.permute.xlu2 %v950_v32  ;;  %vm518_vm4 = vcmask 1043456   ;;  %vm493_vm5 = vcmask 31744   ;;  %s823_s11 = sshll.u32 %s1176_s12, 6 }
   0xe   : > { %s995_s19 = scalar_lea.vmem %s1163_s0, %s822_s16  ;;  %863 = vset.pattern.permute.xlu0 %v950_v32  ;;  %s1087_s18 = scalar_lea.vmem %s1166_s3, %s823_s11 }
   0xf   : > { %v213_v0 = vld [vmem:[%s995_s19 + $0x70] sm:$0xff]  ;;  %v214_v1 = vld [vmem:[%s995_s19 + $0x78] sm:$0xff]  ;;  %v211_v2 = vld [vmem:[%s995_s19 + $0x60] sm:$0xff] }
  0x10   : > { %v260_v3 = vmax.f32 %v213_v0, %v214_v1  ;;  %v236_v4 = vadd.f32 %v214_v1, %v213_v0  ;;  %v212_v5 = vld [vmem:[%s995_s19 + $0x68] sm:$0xff]  ;;  %v209_v7 = vld [vmem:[%s995_s19 + $0x50] sm:$0xff]  ;;  %v210_v8 = vld [vmem:[%s995_s19 + $0x58] sm:$0xff] }
  0x11   : > { %v257_v6 = vmax.f32 %v211_v2, %v212_v5  ;;  %v207_v9 = vld [vmem:[%s995_s19 + $0x40] sm:$0xff]  ;;  %v208_v10 = vld [vmem:[%s995_s19 + $0x48] sm:$0xff]  ;;  %v233_v11 = vadd.f32 %v212_v5, %v211_v2  ;;  %v230_v12 = vadd.f32 %v210_v8, %v209_v7  ;;  %v205_v14 = vld [vmem:[%s995_s19 + $0x30] sm:$0xff]  ;;  %v254_v16 = vmax.f32 %v209_v7, %v210_v8 }
  0x12   : > { %261 = vmax.xlane.f32.xlu1 %v260_v3  ;;  %237 = vadd.xlane.f32.xlu0 %v236_v4  ;;  %v227_v13 = vadd.f32 %v208_v10, %v207_v9  ;;  %v206_v15 = vld [vmem:[%s995_s19 + $0x38] sm:$0xff]  ;;  %v251_v18 = vmax.f32 %v207_v9, %v208_v10  ;;  %v203_v19 = vld [vmem:[%s995_s19 + $0x20] sm:$0xff]  ;;  %v204_v20 = vld [vmem:[%s995_s19 + $0x28] sm:$0xff] }
  0x13   : > { %258 = vmax.xlane.f32.xlu2 %v257_v6  ;;  %v224_v17 = vadd.f32 %v206_v15, %v205_v14  ;;  %v201_v21 = vld [vmem:[%s995_s19 + $0x10] sm:$0xff]  ;;  %v202_v22 = vld [vmem:[%s995_s19 + $0x18] sm:$0xff]  ;;  %v248_v23 = vmax.f32 %v205_v14, %v206_v15  ;;  %v221_v24 = vadd.f32 %v204_v20, %v203_v19  ;;  %v199_v26 = vld [vmem:[%s995_s19] sm:$0xff]  ;;  %v245_v28 = vmax.f32 %v203_v19, %v204_v20 }
  0x14   : > { %v218_v25 = vadd.f32 %v202_v22, %v201_v21  ;;  %v200_v27 = vld [vmem:[%s995_s19 + $0x8] sm:$0xff]  ;;  %v242_v30 = vmax.f32 %v201_v21, %v202_v22 }
  0x15   : > { %v215_v29 = vadd.f32 %v200_v27, %v199_v26  ;;  %v239_v31 = vmax.f32 %v199_v26, %v200_v27 }
  0x1a   : > { %234 = vadd.xlane.f32.xlu0 %v233_v11  ;;  %231 = vadd.xlane.f32.xlu1 %v230_v12 }
  0x1b   : > { %228 = vadd.xlane.f32.xlu2 %v227_v13 }
  0x22   : > { %255 = vmax.xlane.f32.xlu0 %v254_v16  ;;  %225 = vadd.xlane.f32.xlu1 %v224_v17  ;;  %v340_v17 = vlaneseq }
  0x23   : > { %252 = vmax.xlane.f32.xlu2 %v251_v18 }
  0x24   : > { %v341_v19 = vand.u32 127, %v340_v17 }
  0x26   : > { %vm342_vm1 = vcmp.eq.s32.totalorder %v341_v19, 0 }
  0x2a   : > { %249 = vmax.xlane.f32.xlu1 %v248_v23  ;;  %222 = vadd.xlane.f32.xlu0 %v221_v24 }
  0x2b   : > { %219 = vadd.xlane.f32.xlu2 %v218_v25 }
  0x32   : > { %246 = vmax.xlane.f32.xlu0 %v245_v28  ;;  %216 = vadd.xlane.f32.xlu1 %v215_v29 }
  0x33   : > { %243 = vmax.xlane.f32.xlu2 %v242_v30 }
  0x3a   : > { %240 = vmax.xlane.f32.xlu0 %v239_v31 }
  0x85   : > { %v262_v33 = vpop.xlane.xlu1 %261  ;;  %v238_v34 = vpop.xlane.xlu0 %237 }
  0x86   : > { %283 = vst.msk [vmem:[#allocation3 + $0x38] sm:$0xff] %vm267_vm0, %v262_v33  ;;  %v259_v35 = vpop.xlane.xlu2 %258 }
  0x87   : > { %275 = vst.msk [vmem:[#allocation2 + $0x38] sm:$0xff] %vm267_vm0, %v238_v34 }
  0x88   : > { %282 = vst.msk [vmem:[#allocation3 + $0x30] sm:$0xff] %vm267_vm0, %v259_v35 }
  0x8d   : > { %v235_v36 = vpop.xlane.xlu0 %234  ;;  %v232_v37 = vpop.xlane.xlu1 %231  ;;  %v366_v41 = vld [vmem:[#allocation3 + $0x38] sm:$0xff] }
  0x8e   : > { %274 = vst.msk [vmem:[#allocation2 + $0x30] sm:$0xff] %vm267_vm0, %v235_v36  ;;  %v229_v38 = vpop.xlane.xlu2 %228  ;;  %v350_v39 = vld [vmem:[#allocation2 + $0x38] sm:$0xff] }
  0x8f   : > { %273 = vst.msk [vmem:[#allocation2 + $0x28] sm:$0xff] %vm267_vm0, %v232_v37  ;;  %v358_v40 = vmul.f32 0.00390625, %v350_v39  ;;  %v365_v48 = vld [vmem:[#allocation3 + $0x30] sm:$0xff] }
  0x90   : > { %272 = vst.msk [vmem:[#allocation2 + $0x20] sm:$0xff] %vm267_vm0, %v229_v38 }
  0x91   : > { %v852_v42 = vpack.i.bf16 %v366_v41, %v358_v40 }
  0x93   : > { %853 = vperm.xlu1 %851, %v852_v42  }
  0x95   : > { %v256_v43 = vpop.xlane.xlu0 %255  ;;  %v226_v44 = vpop.xlane.xlu1 %225  ;;  %v349_v45 = vld [vmem:[#allocation2 + $0x30] sm:$0xff] }
  0x96   : > { %281 = vst.msk [vmem:[#allocation3 + $0x28] sm:$0xff] %vm267_vm0, %v256_v43  ;;  %v253_v46 = vpop.xlane.xlu2 %252  ;;  %v357_v47 = vmul.f32 0.00390625, %v349_v45  ;;  %v348_v50 = vld [vmem:[#allocation2 + $0x28] sm:$0xff] }
  0x97   : > { %280 = vst.msk [vmem:[#allocation3 + $0x20] sm:$0xff] %vm267_vm0, %v253_v46  ;;  %v347_v51 = vld [vmem:[#allocation2 + $0x20] sm:$0xff]  ;;  %v356_v52 = vmul.f32 0.00390625, %v348_v50 }
  0x98   : > { %271 = vst.msk [vmem:[#allocation2 + $0x18] sm:$0xff] %vm267_vm0, %v226_v44  ;;  %v858_v49 = vpack.i.bf16 %v365_v48, %v357_v47  ;;  %v355_v58 = vmul.f32 0.00390625, %v347_v51  ;;  %v455_v50 = vld [vmem:[%s1164_s1] sm:$0xf] }
  0x9a   : > { %859 = vperm.xlu2 %857, %v858_v49  }
  0x9d   : > { %v250_v53 = vpop.xlane.xlu1 %249  ;;  %v223_v54 = vpop.xlane.xlu0 %222  ;;  %v364_v55 = vld [vmem:[#allocation3 + $0x28] sm:$0xff] }
  0x9e   : > { %279 = vst.msk [vmem:[#allocation3 + $0x18] sm:$0xff] %vm267_vm0, %v250_v53  ;;  %v220_v56 = vpop.xlane.xlu2 %219  ;;  %v864_v57 = vpack.i.bf16 %v364_v55, %v356_v52  ;;  %v363_v59 = vld [vmem:[#allocation3 + $0x20] sm:$0xff] }
  0x9f   : > { %270 = vst.msk [vmem:[#allocation2 + $0x10] sm:$0xff] %vm267_vm0, %v223_v54  ;;  %v869_v60 = vpack.i.bf16 %v363_v59, %v355_v58  ;;  %v346_v61 = vld [vmem:[#allocation2 + $0x18] sm:$0xff]  ;;  %v485_v55 = vld [vmem:[%s1165_s2] sm:$0xff]  ;;  %v491_v58 = vld [vmem:[%s1165_s2 + $0x30] sm:$0xff] }
  0xa0   : > { %269 = vst.msk [vmem:[#allocation2 + $0x8] sm:$0xff] %vm267_vm0, %v220_v56  ;;  %865 = vperm.xlu0 %863, %v864_v57   ;;  %v354_v62 = vmul.f32 0.00390625, %v346_v61  ;;  %v488_v57 = vld [vmem:[%s1165_s2 + $0x18] sm:$0xff]  ;;  %v486_v59 = vld [vmem:[%s1165_s2 + $0x8] sm:$0xff] }
  0xa1   : > { %v492_v61 = vld [vmem:[%s1165_s2 + $0x38] sm:$0xff] }
  0xa2   : > { %870 = vperm.xlu2 %857, %v869_v60   ;;  %v489_v60 = vld [vmem:[%s1165_s2 + $0x20] sm:$0xff] }
  0xa5   : > { %v247_v63 = vpop.xlane.xlu0 %246  ;;  %v362_v0 = vld [vmem:[#allocation3 + $0x18] sm:$0xff]  ;;  %v217_v1 = vpop.xlane.xlu1 %216 }
  0xa6   : > { %278 = vst.msk [vmem:[#allocation3 + $0x10] sm:$0xff] %vm267_vm0, %v247_v63  ;;  %v244_v2 = vpop.xlane.xlu2 %243  ;;  %v874_v3 = vpack.i.bf16 %v362_v0, %v354_v62  ;;  %v345_v4 = vld [vmem:[#allocation2 + $0x10] sm:$0xff]  ;;  %v490_v63 = vld [vmem:[%s1165_s2 + $0x28] sm:$0xff] }
  0xa7   : > { %277 = vst.msk [vmem:[#allocation3 + $0x8] sm:$0xff] %vm267_vm0, %v244_v2  ;;  %v353_v5 = vmul.f32 0.00390625, %v345_v4  ;;  %v344_v6 = vld [vmem:[#allocation2 + $0x8] sm:$0xff]  ;;  %v487_v62 = vld [vmem:[%s1165_s2 + $0x10] sm:$0xff] }
  0xa8   : > { %875 = vperm.xlu1 %851, %v874_v3   ;;  %268 = vst.msk [vmem:[#allocation2] sm:$0xff] %vm267_vm0, %v217_v1  ;;  %v352_v9 = vmul.f32 0.00390625, %v344_v6 }
  0xad   : > { %v241_v7 = vpop.xlane.xlu0 %240  ;;  %v361_v8 = vld [vmem:[#allocation3 + $0x10] sm:$0xff] }
  0xae   : > { %276 = vst.msk [vmem:[#allocation3] sm:$0xff] %vm267_vm0, %v241_v7  ;;  %v879_v10 = vpack.i.bf16 %v361_v8, %v353_v5  ;;  %v360_v11 = vld [vmem:[#allocation3 + $0x8] sm:$0xff] }
  0xaf   : > { %v884_v12 = vpack.i.bf16 %v360_v11, %v352_v9  ;;  %v343_v13 = vld [vmem:[#allocation2] sm:$0xff] }
  0xb0   : > { %880 = vperm.xlu2 %857, %v879_v10   ;;  %v351_v14 = vmul.f32 0.00390625, %v343_v13 }
  0xb1   : > { %885 = vperm.xlu1 %851, %v884_v12  }
  0xb5   : > { %v359_v15 = vld [vmem:[#allocation3] sm:$0xff] }
  0xb6   : > { %v889_v16 = vpack.i.bf16 %v359_v15, %v351_v14 }
  0xb8   : > { %890 = vperm.xlu2 %857, %v889_v16  }
  0xf4   : > { %v860_v18 = vpop.permute.xlu2 %859 }
  0xf5   : > { %v862_v21 = vunpack.i.h.bf16 %v860_v18  ;;  %v861_v22 = vunpack.i.l.bf16 %v860_v18 }
  0xf7   : > { %v453_v26 = vsel %vm342_vm1, %v861_v22, %v862_v21 }
  0xfc   : > { %v871_v27 = vpop.permute.xlu2 %870 }
  0xfd   : > { %v873_v29 = vunpack.i.h.bf16 %v871_v27  ;;  %v872_v30 = vunpack.i.l.bf16 %v871_v27 }
  0xff   : > { %v451_v35 = vsel %vm342_vm1, %v872_v30, %v873_v29 }
 0x105   : > { %v854_v20 = vpop.permute.xlu1 %853 }
 0x106   : > { %v856_v23 = vunpack.i.h.bf16 %v854_v20  ;;  %v855_v24 = vunpack.i.l.bf16 %v854_v20 }
 0x108   : > { %v454_v25 = vsel %vm342_vm1, %v855_v24, %v856_v23 }
 0x109   : > { %468 = vmatpush.msra.mxu0 %v454_v25 }
 0x10a   : > { %v881_v34 = vpop.permute.xlu2 %880 }
 0x10b   : > { %469 = vmatpush.msra.mxu0 %v453_v26  ;;  %v883_v37 = vunpack.i.h.bf16 %v881_v34  ;;  %v882_v38 = vunpack.i.l.bf16 %v881_v34 }
 0x10d   : > { %v449_v42 = vsel %vm342_vm1, %v882_v38, %v883_v37 }
 0x112   : > { %v866_v28 = vpop.permute.xlu0 %865  ;;  %v891_v43 = vpop.permute.xlu2 %890 }
 0x113   : > { %v868_v31 = vunpack.i.h.bf16 %v866_v28  ;;  %v867_v32 = vunpack.i.l.bf16 %v866_v28  ;;  %v893_v45 = vunpack.i.h.bf16 %v891_v43  ;;  %v892_v46 = vunpack.i.l.bf16 %v891_v43 }
 0x115   : > { %v452_v33 = vsel %vm342_vm1, %v867_v32, %v868_v31  ;;  %v447_v51 = vsel %vm342_vm1, %v892_v46, %v893_v45 }
 0x116   : > { %470 = vmatpush.msra.mxu0 %v452_v33 }
 0x118   : > { %471 = vmatpush.msra.mxu0 %v451_v35 }
 0x11a   : > { %v876_v36 = vpop.permute.xlu1 %875 }
 0x11b   : > { %v878_v39 = vunpack.i.h.bf16 %v876_v36  ;;  %v877_v40 = vunpack.i.l.bf16 %v876_v36 }
 0x11d   : > { %v450_v41 = vsel %vm342_vm1, %v877_v40, %v878_v39 }
 0x11e   : > { %472 = vmatpush.msra.mxu0 %v450_v41 }
 0x120   : > { %473 = vmatpush.msra.mxu0 %v449_v42 }
 0x123   : > { %v886_v44 = vpop.permute.xlu1 %885 }
 0x124   : > { %v888_v47 = vunpack.i.h.bf16 %v886_v44  ;;  %v887_v48 = vunpack.i.l.bf16 %v886_v44 }
 0x126   : > { %v448_v49 = vsel %vm342_vm1, %v887_v48, %v888_v47 }
 0x127   : > { %474 = vmatpush.msra.mxu0 %v448_v49 }
 0x129   : > { %475 = vmatpush.msra.mxu0 %v447_v51 }
 0x12a   : > { %802 = vmatmul.msk.f32.vlgmr.msra.gmra.mxu0 %vm456_vm2, %v455_v50 }
 0x1a7   : > { %v477_v52 = vpop.f32.mrf.mxu0 }
 0x1a8   : > { %v480_v53 = vmax.f32 %v477_v52, 0.0 }
 0x1aa   : > { %v482_v54 = vsel %vm481_vm3, %v480_v53, 0.0 }
 0x1ab   : > { %483 = vadd.xlane.f32.xlu1 %v482_v54 }
 0x21e   : > { %v484_v56 = vpop.xlane.xlu1 %483 }
 0x21f   : > { %803 = vmatpush.msk.msra.mxu1 %vm518_vm4, %v484_v56  ;;  %824 = vmatpush.msk.msra.mxu2 %vm518_vm4, %v484_v56 }
 0x220   : > { %825 = vmatpush.msk.msra.mxu3 %vm518_vm4, %v484_v56  ;;  %804 = vmatmul.msk.f32.vlgmr.msra.gmra.mxu1 %vm493_vm5, %v485_v55 }
 0x221   : > { %807 = vmatmul.msk.f32.vlgmr.msra.gmra.mxu2 %vm493_vm5, %v488_v57  ;;  %810 = vmatmul.msk.f32.vlgmr.msra.gmra.mxu3 %vm493_vm5, %v491_v58 }
 0x228   : > { %805 = vmatmul.msk.f32.gmra.mxu1 %vm493_vm5, %v486_v59 }
 0x229   : > { %808 = vmatmul.msk.f32.gmra.mxu2 %vm493_vm5, %v489_v60  ;;  %811 = vmatmul.msk.f32.gmra.mxu3 %vm493_vm5, %v492_v61 }
 0x230   : > { %806 = vmatmul.msk.f32.gmra.mxu1 %vm493_vm5, %v487_v62 }
 0x231   : > { %809 = vmatmul.msk.f32.gmra.mxu2 %vm493_vm5, %v490_v63 }
 0x29d   : > { %v539_v0 = vpop.f32.mrf.mxu1 }
 0x29e   : > { %v812_v1 = vmul.f32 -1.442695, %v539_v0 }
 0x2a0   : > { %894 = vpow2.f32 %v812_v1 }
 0x2a4   : > { %v548_v2 = vpop.f32.mrf.mxu2  ;;  %v557_v3 = vpop.f32.mrf.mxu3 }
 0x2a5   : > { %v815_v4 = vmul.f32 -1.442695, %v548_v2  ;;  %v818_v5 = vmul.f32 -1.442695, %v557_v3  ;;  %v542_v6 = vpop.f32.mrf.mxu1 }
 0x2a6   : > { %v895_v7 = vpop.eup %894  ;;  %v813_v8 = vmul.f32 -1.442695, %v542_v6 }
 0x2a7   : > { %v587_v9 = vadd.f32 1.0, %v895_v7  ;;  %896 = vpow2.f32 %v815_v4 }
 0x2a8   : > { %898 = vpow2.f32 %v818_v5 }
 0x2a9   : > { %900 = vrcp.f32 %v587_v9  ;;  %v604_v24 = vand.u32 2147483647, %v587_v9  ;;  %v606_v26 = vand.u32 2147483648, %v587_v9  ;;  %vm600_vm6 = vweird.f32 %v587_v9 }
 0x2aa   : > { %902 = vpow2.f32 %v813_v8 }
 0x2ab   : > { %vm605_vm8 = vcmp.eq.f32.partialorder %v604_v24, 8.507059e+37  ;;  %v607_v35 = vor.u32 1.1754944e-38, %v606_v26 }
 0x2ac   : > { %v551_v10 = vpop.f32.mrf.mxu2  ;;  %v560_v11 = vpop.f32.mrf.mxu3 }
 0x2ad   : > { %v897_v12 = vpop.eup %896  ;;  %v816_v13 = vmul.f32 -1.442695, %v551_v10  ;;  %v545_v16 = vpop.f32.mrf.mxu1  ;;  %v819_v19 = vmul.f32 -1.442695, %v560_v11 }
 0x2ae   : > { %v899_v14 = vpop.eup %898  ;;  %v1072_v15 = vadd.f32 1.0, %v897_v12  ;;  %v814_v22 = vmul.f32 -1.442695, %v545_v16 }
 0x2af   : > { %v901_v17 = vpop.eup %900  ;;  %v1074_v18 = vadd.f32 1.0, %v899_v14  ;;  %904 = vpow2.f32 %v816_v13 }
 0x2b0   : > { %v903_v20 = vpop.eup %902  ;;  %v596_v21 = vmul.f32 %v901_v17, %v587_v9  ;;  %906 = vrcp.f32 %v1072_v15  ;;  %vm601_vm7 = vweird.f32 %v901_v17  ;;  %vm645_vm10 = vweird.f32 %v1072_v15 }
 0x2b1   : > { %908 = vrcp.f32 %v1074_v18  ;;  %v1078_v25 = vadd.f32 1.0, %v903_v20  ;;  %vm602_vm9 = vmor %vm600_vm6, %vm601_vm7  ;;  %v649_v37 = vand.u32 2147483647, %v1072_v15  ;;  %v651_v39 = vand.u32 2147483648, %v1072_v15 }
 0x2b2   : > { %v597_v23 = vsub.f32 1.0, %v596_v21  ;;  %910 = vpow2.f32 %v819_v19  ;;  %vm690_vm11 = vweird.f32 %v1074_v18  ;;  %v696_v44 = vand.u32 2147483648, %v1074_v18 }
 0x2b3   : > { %912 = vrcp.f32 %v1078_v25  ;;  %v694_v47 = vand.u32 2147483647, %v1074_v18  ;;  %vm1102_vm13 = vcmp.eq.f32.partialorder %v649_v37, 8.507059e+37  ;;  %v619_v54 = vand.u32 2147483647, %v1078_v25 }
 0x2b4   : > { %v598_v27 = vmul.f32 %v901_v17, %v597_v23  ;;  %v554_v28 = vpop.f32.mrf.mxu2  ;;  %914 = vpow2.f32 %v814_v22  ;;  %v652_v56 = vor.u32 1.1754944e-38, %v651_v39  ;;  %v697_v57 = vor.u32 1.1754944e-38, %v696_v44 }
 0x2b5   : > { %v905_v29 = vpop.eup %904  ;;  %v817_v33 = vmul.f32 -1.442695, %v554_v28  ;;  %vm615_vm1 = vweird.f32 %v1078_v25  ;;  %v621_v61 = vand.u32 2147483648, %v1078_v25  ;;  %vm695_vm4 = vcmp.eq.f32.partialorder %v694_v47, 8.507059e+37 }
 0x2b6   : > { %v907_v30 = vpop.eup %906  ;;  %v599_v31 = vadd.f32 %v901_v17, %v598_v27  ;;  %v1082_v32 = vadd.f32 1.0, %v905_v29  ;;  %vm1120_vm5 = vcmp.eq.f32.partialorder %v619_v54, 8.507059e+37 }
 0x2b7   : > { %v909_v34 = vpop.eup %908  ;;  %v641_v36 = vmul.f32 %v907_v30, %v1072_v15  ;;  %vm646_vm12 = vweird.f32 %v907_v30  ;;  %v622_v10 = vor.u32 1.1754944e-38, %v621_v61 }
 0x2b8   : > { %v603_v38 = vsel %vm602_vm9, %v901_v17, %v599_v31  ;;  %v686_v40 = vmul.f32 %v909_v34, %v1074_v18  ;;  %916 = vrcp.f32 %v1082_v32  ;;  %v911_v41 = vpop.eup %910  ;;  %vm691_vm14 = vweird.f32 %v909_v34  ;;  %vm647_vm15 = vmor %vm645_vm10, %vm646_vm12 }
 0x2b9   : > { %v608_v42 = vsel %vm605_vm8, %v607_v35, %v603_v38  ;;  %v642_v43 = vsub.f32 1.0, %v641_v36  ;;  %v913_v45 = vpop.eup %912  ;;  %v1100_v48 = vadd.f32 1.0, %v911_v41  ;;  %918 = vpow2.f32 %v817_v33  ;;  %vm692_vm2 = vmor %vm690_vm11, %vm691_vm14 }
 0x2ba   : > { %716 = vst.msk [vmem:[%s1087_s18] sm:$0xff] %vm267_vm0, %v608_v42  ;;  %v687_v46 = vsub.f32 1.0, %v686_v40  ;;  %v915_v49 = vpop.eup %914  ;;  %v611_v52 = vmul.f32 %v913_v45, %v1078_v25  ;;  %vm616_vm3 = vweird.f32 %v913_v45  ;;  %v664_v11 = vand.u32 2147483647, %v1082_v32 }
 0x2bb   : > { %v643_v50 = vmul.f32 %v907_v30, %v642_v43  ;;  %920 = vrcp.f32 %v1100_v48  ;;  %v1113_v62 = vadd.f32 1.0, %v915_v49  ;;  %vm617_vm6 = vmor %vm615_vm1, %vm616_vm3  ;;  %v666_v12 = vand.u32 2147483648, %v1082_v32 }
 0x2bc   : > { %v688_v53 = vmul.f32 %v909_v34, %v687_v46  ;;  %v612_v58 = vsub.f32 1.0, %v611_v52  ;;  %vm660_vm8 = vweird.f32 %v1082_v32  ;;  %vm665_vm10 = vcmp.eq.f32.partialorder %v664_v11, 8.507059e+37 }
 0x2bd   : > { %v644_v55 = vadd.f32 %v907_v30, %v643_v50  ;;  %922 = vrcp.f32 %v1113_v62  ;;  %v667_v20 = vor.u32 1.1754944e-38, %v666_v12  ;;  %v709_v21 = vand.u32 2147483647, %v1100_v48 }
 0x2be   : > { %v917_v59 = vpop.eup %916  ;;  %v689_v60 = vadd.f32 %v909_v34, %v688_v53  ;;  %v613_v0 = vmul.f32 %v913_v45, %v612_v58  ;;  %v711_v22 = vand.u32 2147483648, %v1100_v48  ;;  %vm705_vm11 = vweird.f32 %v1100_v48 }
 0x2bf   : > { %v648_v63 = vsel %vm647_vm15, %v907_v30, %v644_v55  ;;  %v656_v1 = vmul.f32 %v917_v59, %v1082_v32  ;;  %v919_v2 = vpop.eup %918  ;;  %vm661_vm7 = vweird.f32 %v917_v59  ;;  %vm710_vm14 = vcmp.eq.f32.partialorder %v709_v21, 8.507059e+37 }
 0x2c0   : > { %v653_v3 = vsel %vm1102_vm13, %v652_v56, %v648_v63  ;;  %v693_v4 = vsel %vm692_vm2, %v909_v34, %v689_v60  ;;  %v614_v7 = vadd.f32 %v913_v45, %v613_v0  ;;  %v592_v13 = vadd.f32 1.0, %v919_v2  ;;  %vm662_vm9 = vmor %vm660_vm8, %vm661_vm7 }
 0x2c1   : > { %719 = vst.msk [vmem:[%s1087_s18 + $0x18] sm:$0xff] %vm267_vm0, %v653_v3  ;;  %v698_v6 = vsel %vm695_vm4, %v697_v57, %v693_v4  ;;  %v657_v8 = vsub.f32 1.0, %v656_v1  ;;  %v921_v9 = vpop.eup %920  ;;  %v712_v30 = vor.u32 1.1754944e-38, %v711_v22  ;;  %vm630_vm15 = vweird.f32 %v1113_v62 }
 0x2c2   : > { %722 = vst.msk [vmem:[%s1087_s18 + $0x30] sm:$0xff] %vm267_vm0, %v698_v6  ;;  %v618_v14 = vsel %vm617_vm6, %v913_v45, %v614_v7  ;;  %v701_v16 = vmul.f32 %v921_v9, %v1100_v48  ;;  %924 = vrcp.f32 %v592_v13  ;;  %vm706_vm12 = vweird.f32 %v921_v9 }
 0x2c3   : > { %v658_v15 = vmul.f32 %v917_v59, %v657_v8  ;;  %v623_v17 = vsel %vm1120_vm5, %v622_v10, %v618_v14  ;;  %v923_v23 = vpop.eup %922  ;;  %vm707_vm13 = vmor %vm705_vm11, %vm706_vm12  ;;  %v636_v33 = vand.u32 2147483648, %v1113_v62  ;;  %v634_v37 = vand.u32 2147483647, %v1113_v62 }
 0x2c4   : > { %717 = vst.msk [vmem:[%s1087_s18 + $0x8] sm:$0xff] %vm267_vm0, %v623_v17  ;;  %v702_v19 = vsub.f32 1.0, %v701_v16  ;;  %v626_v27 = vmul.f32 %v923_v23, %v1113_v62  ;;  %vm631_vm1 = vweird.f32 %v923_v23  ;;  %v681_v40 = vand.u32 2147483648, %v592_v13 }
 0x2c5   : > { %v659_v18 = vadd.f32 %v917_v59, %v658_v15  ;;  %vm632_vm2 = vmor %vm630_vm15, %vm631_vm1  ;;  %v637_v41 = vor.u32 1.1754944e-38, %v636_v33  ;;  %v679_v43 = vand.u32 2147483647, %v592_v13  ;;  %vm635_vm4 = vcmp.eq.f32.partialorder %v634_v37, 8.507059e+37 }
 0x2c6   : > { %v703_v25 = vmul.f32 %v921_v9, %v702_v19  ;;  %v627_v31 = vsub.f32 1.0, %v626_v27  ;;  %vm675_vm5 = vweird.f32 %v592_v13  ;;  %v682_v47 = vor.u32 1.1754944e-38, %v681_v40 }
 0x2c7   : > { %v663_v24 = vsel %vm662_vm9, %v917_v59, %v659_v18  ;;  %vm680_vm7 = vcmp.eq.f32.partialorder %v679_v43, 8.507059e+37 }
 0x2c8   : > { %v668_v26 = vsel %vm665_vm10, %v667_v20, %v663_v24  ;;  %v704_v28 = vadd.f32 %v921_v9, %v703_v25  ;;  %v925_v29 = vpop.eup %924  ;;  %v628_v36 = vmul.f32 %v923_v23, %v627_v31 }
 0x2c9   : > { %720 = vst.msk [vmem:[%s1087_s18 + $0x20] sm:$0xff] %vm267_vm0, %v668_v26  ;;  %v671_v34 = vmul.f32 %v925_v29, %v592_v13  ;;  %vm676_vm3 = vweird.f32 %v925_v29 }
 0x2ca   : > { %v708_v32 = vsel %vm707_vm13, %v921_v9, %v704_v28  ;;  %v629_v39 = vadd.f32 %v923_v23, %v628_v36  ;;  %vm677_vm6 = vmor %vm675_vm5, %vm676_vm3 }
 0x2cb   : > { %v713_v35 = vsel %vm710_vm14, %v712_v30, %v708_v32  ;;  %v672_v38 = vsub.f32 1.0, %v671_v34 }
 0x2cc   : > { %723 = vst.msk [vmem:[%s1087_s18 + $0x38] sm:$0xff] %vm267_vm0, %v713_v35  ;;  %v633_v44 = vsel %vm632_vm2, %v923_v23, %v629_v39 }
 0x2cd   : > { %v673_v42 = vmul.f32 %v925_v29, %v672_v38  ;;  %v638_v45 = vsel %vm635_vm4, %v637_v41, %v633_v44 }
 0x2ce   : > { %718 = vst.msk [vmem:[%s1087_s18 + $0x10] sm:$0xff] %vm267_vm0, %v638_v45 }
 0x2cf   : > { %v674_v46 = vadd.f32 %v925_v29, %v673_v42 }
 0x2d1   : > { %v678_v48 = vsel %vm677_vm6, %v925_v29, %v674_v46 }
 0x2d2   : > { %v683_v49 = vsel %vm680_vm7, %v682_v47, %v678_v48 }
 0x2d3   : > { %721 = vst.msk [vmem:[%s1087_s18 + $0x28] sm:$0xff] %vm267_vm0, %v683_v49 }
 0x2d4 PF: > { %s13_s14 = sadd.s32 1, %s948_s14   ;;  %s1171_s12 = smov %s944_s13 }
 0x2d5   : > { %p10_p5 = scmp.ge.s32.totalorder %s13_s14, 4   ;;  %s1172_s13 = smov %s1174_s15 }
 0x2d7   :  { %12 = sbr.rel (!%p10_p5) target bundleno = 2 (0x2), region = 74 }

</bundles_post_ra>
